<compile_context>
chip_gen: v5e
topology: v5e:2x2
jax: 0.10.0
libtpu: 0.0.40
codegen_flags: <defaults>
</compile_context>

<pallas_src>
import math
import numpy as np

import jax
import jax.numpy as jnp
from jax import lax
from jax.experimental import pallas as pl
from jax.experimental.pallas import tpu as pltpu

# ----------------------------- config ---------------------------------------
NUM_AGENTTYPES = 2
H_DIM = 64
NUM_EDGE_TYPES = 3
GN_NG = 32
NUM_GROUPS = math.gcd(GN_NG, H_DIM)          # 32
GROUP_SIZE = H_DIM // NUM_GROUPS             # 2
EPS = 1e-5
TE = 512                                     # max edge rows per grid step
AD_IN = 2 + 2 * NUM_AGENTTYPES               # dist(2) + at_src + at_dst = 6
AD_PAD = 8                                   # padded K for the fused at/dist matmul

assert GROUP_SIZE == 2, "pair GroupNorm specialization requires gcd(32, h_dim) * 2 == h_dim"
# TODO(synk): for configs with GROUP_SIZE != 2 fall back to a block-diagonal
#             group-mask matmul for the GroupNorm statistics.

# vec64 rows: 0 b_f1  1 ln_g  2 ln_b  3 b1  4 b1_swap  5 gn1_g  6 gn1_b
#             7 b2  8 b2_swap  9 gn2_g  10 gn2_b
N_VEC64_ROWS = 11


# ----------------------------- Pallas kernel --------------------------------
def relation_header_kernel(xsd_ref, atd_ref, w_ad_ref, w_f1x_ref, w_f1ad_ref,
                           w1_ref, w1p_ref, w2_ref, w2p_ref, w_out_ref,
                           vec128_ref, vec64_ref, b_out_ref, out_ref):
    f32 = jnp.float32
    bf16 = jnp.bfloat16
    xsd = xsd_ref[...]              # [TE, 2H]  bf16  = [x_src | x_dst]
    atd = atd_ref[...]              # [TE, 8]   bf16  = [dist | at_src | at_dst | 0]
    v128 = vec128_ref[...]          # [2, 2H]   f32   (fused-branch GN gamma/beta)
    v64 = vec64_ref[...]            # [11, H]   f32

    def pair_norm(d, g, b):
        # GroupNorm with groups of size 2:  y - mean == d,  var == d^2  exactly,
        # with d = (y - partner) / 2.
        return d * lax.rsqrt(d * d + EPS) * g + b

    # ---- fused agenttype/dist branch: one [TE,8] @ [8,2H] matmul.  Output
    # lanes are permuted (at pack time) so GN partners sit H_DIM lanes apart:
    # partner = half-lane rotation on the XLU, no extra MXU work.
    ad = jnp.dot(atd, w_ad_ref[...], preferred_element_type=f32)
    d_ad = (ad - pltpu.roll(ad, shift=H_DIM, axis=1)) * 0.5
    ad = jnp.maximum(pair_norm(d_ad, v128[0:1], v128[1:2]), 0.0)

    # ---- f_1e MLP: Linear(4h -> h) as two lane-dense K=2H matmuls + bias,
    # LayerNorm, ReLU.
    z = (jnp.dot(xsd, w_f1x_ref[...], preferred_element_type=f32)
         + jnp.dot(ad.astype(bf16), w_f1ad_ref[...], preferred_element_type=f32)
         + v64[0:1])
    mean = jnp.mean(z, axis=-1, keepdims=True)
    var = jnp.mean((z - mean) ** 2, axis=-1, keepdims=True)
    h1e = jnp.maximum((z - mean) * lax.rsqrt(var + EPS) * v64[1:2] + v64[2:3],
                      0.0)

    # ---- LinearRes(h, h): GN partner pre-activations come from pair-swapped
    # weight columns (shared LHS), so no cross-lane op is needed at 64 lanes.
    o1 = jnp.dot(h1e, w1_ref[...], preferred_element_type=f32) + v64[3:4]
    p1 = jnp.dot(h1e, w1p_ref[...], preferred_element_type=f32) + v64[4:5]
    o = jnp.maximum(pair_norm((o1 - p1) * 0.5, v64[5:6], v64[6:7]), 0.0)

    o2 = jnp.dot(o, w2_ref[...], preferred_element_type=f32) + v64[7:8]
    p2 = jnp.dot(o, w2p_ref[...], preferred_element_type=f32) + v64[8:9]
    o = pair_norm((o2 - p2) * 0.5, v64[9:10], v64[10:11])
    o = jnp.maximum(o + h1e, 0.0)

    # ---- final nn.Linear(h -> num_edge_types)
    out_ref[...] = (jnp.dot(o, w_out_ref[...], preferred_element_type=f32)
                    + b_out_ref[...])


# ----------------------------- wrapper ---------------------------------------
def relation_header_pallas(kp, xt_enc, agenttypes, ctrs, src, dst):
    """Edge logits for every directed edge (src[e] -> dst[e])."""
    E = int(src.shape[0])
    if E == 0:
        return jnp.zeros((0, NUM_EDGE_TYPES), jnp.float32)
    bf16 = jnp.bfloat16

    # TODO(synk): for very large scenes, gather xt_enc per tile in-kernel
    #             (scalar-prefetched src/dst) instead of materializing [E,2H].
    xt_bf = xt_enc.astype(bf16)                                          # cast before gather
    xsd = jnp.concatenate([xt_bf[src], xt_bf[dst]], axis=-1)             # [E, 2H] bf16
    atd = jnp.concatenate(
        [ctrs[dst] - ctrs[src], agenttypes[src], agenttypes[dst],
         jnp.zeros((E, AD_PAD - AD_IN), jnp.float32)], axis=-1).astype(bf16)  # [E, 8]

    # Adaptive edge tile: full TE for big scenes, shrunk-to-fit for tiny ones.
    te = TE if E > TE else max(8, ((E + 7) // 8) * 8)
    E_pad = ((E + te - 1) // te) * te
    xsd = jnp.pad(xsd, ((0, E_pad - E), (0, 0)))
    atd = jnp.pad(atd, ((0, E_pad - E), (0, 0)))

    def edge_spec(f):
        return pl.BlockSpec((te, f), lambda i: (i, 0))

    def full_spec(a):
        return pl.BlockSpec(a.shape, lambda i: (0,) * a.ndim)

    out = pl.pallas_call(
        relation_header_kernel,
        out_shape=jax.ShapeDtypeStruct((E_pad, NUM_EDGE_TYPES), jnp.float32),
        grid=(E_pad // te,),
        in_specs=[
            edge_spec(2 * H_DIM),       # xsd
            edge_spec(AD_PAD),          # atd
            full_spec(kp['w_ad']),
            full_spec(kp['w_f1x']),
            full_spec(kp['w_f1ad']),
            full_spec(kp['w1']),
            full_spec(kp['w1p']),
            full_spec(kp['w2']),
            full_spec(kp['w2p']),
            full_spec(kp['w_out']),
            full_spec(kp['vec128']),
            full_spec(kp['vec64']),
            full_spec(kp['b_out']),
        ],
        out_specs=pl.BlockSpec((te, NUM_EDGE_TYPES), lambda i: (i, 0)),
        compiler_params=pltpu.CompilerParams(
            dimension_semantics=("parallel",)),
    )(xsd, atd, kp['w_ad'], kp['w_f1x'], kp['w_f1ad'], kp['w1'], kp['w1p'],
      kp['w2'], kp['w2p'], kp['w_out'], kp['vec128'], kp['vec64'], kp['b_out'])
    return out[:E]


def trainer_forward(kp, dd):
    """FJMPHeaderEncoderTrainer.forward(dd, train=False) -> relations_preds."""
    src, dst = build_edges(np.asarray(dd['batch_idxs']))
    edge_logits = relation_header_pallas(
        kp, dd['xt_enc'], dd['agenttypes'], dd['ctrs'],
        jnp.asarray(src), jnp.asarray(dst))
    # dgl_graph.remove_edges(eids where src > dst); kept edges stay in order.
    keep = np.where(src <= dst)[0]
    return edge_logits[jnp.asarray(keep)]


# ----------------------------- graph glue ------------------------------------
def build_edges(batch_idxs):
    """init_dgl_graph equivalent: per scenario, all ordered (i, j), i != j."""
    src_list, dst_list = [], []
    offset = 0
    for sid in np.unique(batch_idxs):
        si = int((batch_idxs == sid).sum())
        assert si > 0
        if si > 1:
            off_diag = np.ones((si, si)) - np.eye(si)
            rs, rd = np.where(off_diag)
            src_list.append(rs + offset)
            dst_list.append(rd + offset)
        offset += si
    if src_list:
        src = np.concatenate(src_list).astype(np.int32)
        dst = np.concatenate(dst_list).astype(np.int32)
    else:
        src = np.zeros((0,), np.int32)
        dst = np.zeros((0,), np.int32)
    return src, dst


# ----------------------------- parameters ------------------------------------
def make_module_params(key):
    """Module-layout parameters (matches FJMPRelationHeader.init_weights)."""
    ks = jax.random.split(key, 6)

    def xavier(k, fi, fo):
        std = math.sqrt(2.0 / (fi + fo))
        return (std * jax.random.normal(k, (fi, fo))).astype(jnp.float32)

    ones = jnp.ones((H_DIM,), jnp.float32)
    zeros = jnp.zeros((H_DIM,), jnp.float32)
    return {
        'w_at': xavier(ks[0], 2 * NUM_AGENTTYPES, H_DIM),
        'w_dist': xavier(ks[1], 2, H_DIM),
        'w_f1': xavier(ks[2], 4 * H_DIM, H_DIM),
        'b_f1': jnp.full((H_DIM,), 0.1, jnp.float32),
        'w1': xavier(ks[3], H_DIM, H_DIM),
        'b1': jnp.full((H_DIM,), 0.1, jnp.float32),
        'w2': xavier(ks[4], H_DIM, H_DIM),
        'b2': jnp.full((H_DIM,), 0.1, jnp.float32),
        'w_out': xavier(ks[5], H_DIM, NUM_EDGE_TYPES),
        'b_out': jnp.full((NUM_EDGE_TYPES,), 0.1, jnp.float32),
        'gn_at_g': ones, 'gn_at_b': zeros,
        'gn_dist_g': ones, 'gn_dist_b': zeros,
        'ln_g': ones, 'ln_b': zeros,
        'gn1_g': ones, 'gn1_b': zeros,
        'gn2_g': ones, 'gn2_b': zeros,
    }


def pack_params(mp):
    """Kernel-layout packing: fused/lane-dense weights + pair-swapped partners."""
    f32 = np.float32
    H = H_DIM
    w_at = np.asarray(mp['w_at'], f32)
    w_dist = np.asarray(mp['w_dist'], f32)
    w_f1 = np.asarray(mp['w_f1'], f32)
    w1 = np.asarray(mp['w1'], f32)
    w2 = np.asarray(mp['w2'], f32)
    b1 = np.asarray(mp['b1'], f32)
    b2 = np.asarray(mp['b2'], f32)

    # fused agenttype/dist projection: natural output layout = [dist | at_enc],
    # then permute output lanes so GN partners (pairs) sit H lanes apart.
    w_ad_nat = np.zeros((AD_PAD, 2 * H), f32)
    w_ad_nat[0:2, 0:H] = w_dist
    w_ad_nat[2:2 + 2 * NUM_AGENTTYPES, H:2 * H] = w_at
    perm128 = np.concatenate([np.arange(0, 2 * H, 2), np.arange(1, 2 * H, 2)])
    w_ad = w_ad_nat[:, perm128]
    gn_ad_g = np.concatenate([np.asarray(mp['gn_dist_g'], f32),
                              np.asarray(mp['gn_at_g'], f32)])[perm128]
    gn_ad_b = np.concatenate([np.asarray(mp['gn_dist_b'], f32),
                              np.asarray(mp['gn_at_b'], f32)])[perm128]

    # f_1e split weights; module concat order = [x_src, x_dst, dist, at_enc].
    w_f1x = w_f1[0:2 * H]                       # consumes [x_src | x_dst]
    w_f1ad = w_f1[2 * H:4 * H][perm128]         # consumes permuted [dist | at_enc]

    # pair-swap (partner) permutation within groups of size 2.
    swap64 = np.arange(H).reshape(H // 2, 2)[:, ::-1].reshape(H)

    vec128 = np.stack([gn_ad_g, gn_ad_b]).astype(f32)
    vec64 = np.stack([
        np.asarray(mp['b_f1'], f32), np.asarray(mp['ln_g'], f32),
        np.asarray(mp['ln_b'], f32),
        b1, b1[swap64], np.asarray(mp['gn1_g'], f32), np.asarray(mp['gn1_b'], f32),
        b2, b2[swap64], np.asarray(mp['gn2_g'], f32), np.asarray(mp['gn2_b'], f32),
    ]).astype(f32)
    assert vec64.shape == (N_VEC64_ROWS, H)

    bf16 = jnp.bfloat16
    return {
        'w_ad': jnp.asarray(w_ad).astype(bf16),
        'w_f1x': jnp.asarray(w_f1x).astype(bf16),
        'w_f1ad': jnp.asarray(w_f1ad).astype(bf16),
        'w1': jnp.asarray(w1), 'w1p': jnp.asarray(w1[:, swap64]),
        'w2': jnp.asarray(w2), 'w2p': jnp.asarray(w2[:, swap64]),
        'w_out': jnp.asarray(np.asarray(mp['w_out'], f32)),
        'b_out': jnp.asarray(np.asarray(mp['b_out'], f32).reshape(1, NUM_EDGE_TYPES)),
        'vec128': jnp.asarray(vec128),
        'vec64': jnp.asarray(vec64),
    }


# ----------------------------- pure-JAX reference ----------------------------
# Module-structured reference (unpacked weights, concat-form matmuls).  It
# mirrors the kernel's mixed-precision policy — bf16 operands for the input
# side (agenttype/dist/f_1e) matmuls, f32 everywhere else — so the tolerance
# checks the kernel arithmetic and weight packing, not the dtype policy.
def relation_header_ref(mp, xt_enc, agenttypes, ctrs, src, dst):
    f32, bf16 = jnp.float32, jnp.bfloat16

    def mm_bf16(a, w):
        return jnp.dot(a.astype(bf16), w.astype(bf16), preferred_element_type=f32)

    def mm_f32(a, w):
        return jnp.dot(a, w, preferred_element_type=f32)

    def gn(y, g, b):
        yr = y.reshape(y.shape[0], NUM_GROUPS, GROUP_SIZE)
        mean = yr.mean(-1, keepdims=True)
        var = ((yr - mean) ** 2).mean(-1, keepdims=True)
        yn = ((yr - mean) * lax.rsqrt(var + EPS)).reshape(y.shape)
        return yn * g + b

    def ln(y, g, b):
        mean = y.mean(-1, keepdims=True)
        var = ((y - mean) ** 2).mean(-1, keepdims=True)
        return (y - mean) * lax.rsqrt(var + EPS) * g + b

    at_cat = jnp.concatenate([agenttypes[src], agenttypes[dst]], axis=-1)
    dist_in = ctrs[dst] - ctrs[src]
    at_enc = jnp.maximum(gn(mm_bf16(at_cat, mp['w_at']),
                            mp['gn_at_g'], mp['gn_at_b']), 0.0)
    dist = jnp.maximum(gn(mm_bf16(dist_in, mp['w_dist']),
                          mp['gn_dist_g'], mp['gn_dist_b']), 0.0)
    cat = jnp.concatenate([xt_enc[src], xt_enc[dst], dist, at_enc], axis=-1)
    h1e = jnp.maximum(ln(mm_bf16(cat, mp['w_f1']) + mp['b_f1'],
                         mp['ln_g'], mp['ln_b']), 0.0)
    o = jnp.maximum(gn(mm_f32(h1e, mp['w1']) + mp['b1'],
                       mp['gn1_g'], mp['gn1_b']), 0.0)
    o = gn(mm_f32(o, mp['w2']) + mp['b2'], mp['gn2_g'], mp['gn2_b'])
    o = jnp.maximum(o + h1e, 0.0)
    return mm_f32(o, mp['w_out']) + mp['b_out']


# ----------------------------- main -------------------------------------------
if __name__ == "__main__":
    key = jax.random.PRNGKey(0)
    k_par, k_ctr, k_at, k_xt = jax.random.split(key, 4)

    mp = make_module_params(k_par)
    kp = pack_params(mp)

    # two scenarios: 5 + 4 agents  ->  20 + 12 = 32 directed edges
    batch_idxs = np.array([0] * 5 + [1] * 4, np.int32)
    N = batch_idxs.shape[0]

    ctrs = jax.random.normal(k_ctr, (N, 2), jnp.float32)
    at_idx = jax.random.randint(k_at, (N,), 0, NUM_AGENTTYPES)
    agenttypes = jax.nn.one_hot(at_idx, NUM_AGENTTYPES, dtype=jnp.float32)
    # stand-in for FJMPFeatureEncoder output (graph.ndata['xt_enc'])
    xt_enc = jax.random.normal(k_xt, (N, H_DIM), jnp.float32)

    dd = {
        'batch_idxs': batch_idxs,
        'ctrs': ctrs,
        'agenttypes': agenttypes,
        'xt_enc': xt_enc,
    }

    relations_preds = trainer_forward(kp, dd)
    relations_preds = jax.block_until_ready(relations_preds)

    # correctness check vs. pure-JAX reference (same edge filtering)
    src, dst = build_edges(batch_idxs)
    ref_all = relation_header_ref(mp, xt_enc, agenttypes, ctrs,
                                  jnp.asarray(src), jnp.asarray(dst))
    ref = ref_all[jnp.asarray(np.where(src <= dst)[0])]

    assert relations_preds.shape == ref.shape == (16, NUM_EDGE_TYPES)
    np.testing.assert_allclose(np.asarray(relations_preds), np.asarray(ref),
                               rtol=2e-2, atol=2e-2)
    print("KERNEL_OK")
</pallas_src>

<mosaic_0001>
module attributes {stable_mosaic.version = 11 : i64} {
  func.func @relation_header_kernel(%arg0: i32, %arg1: memref<32x128xbf16, #tpu.memory_space<vmem>>, %arg2: memref<32x8xbf16, #tpu.memory_space<vmem>>, %arg3: memref<8x128xbf16, #tpu.memory_space<vmem>>, %arg4: memref<128x64xbf16, #tpu.memory_space<vmem>>, %arg5: memref<128x64xbf16, #tpu.memory_space<vmem>>, %arg6: memref<64x64xf32, #tpu.memory_space<vmem>>, %arg7: memref<64x64xf32, #tpu.memory_space<vmem>>, %arg8: memref<64x64xf32, #tpu.memory_space<vmem>>, %arg9: memref<64x64xf32, #tpu.memory_space<vmem>>, %arg10: memref<64x3xf32, #tpu.memory_space<vmem>>, %arg11: memref<2x128xf32, #tpu.memory_space<vmem>>, %arg12: memref<11x64xf32, #tpu.memory_space<vmem>>, %arg13: memref<1x3xf32, #tpu.memory_space<vmem>>, %arg14: memref<32x3xf32, #tpu.memory_space<vmem>>) attributes {dimension_semantics = [#tpu.dimension_semantics<parallel>], iteration_bounds = array<i64: 1>, scalar_prefetch = 0 : i64, scratch_operands = 0 : i64, tpu.core_type = #tpu.core_type<tc>, window_params = [{transform_indices = @transform_0, window_bounds = array<i64: 32, 128>}, {transform_indices = @transform_1, window_bounds = array<i64: 32, 8>}, {pipeline_mode = #tpu.pipeline_mode<synchronous>, transform_indices = @transform_2, window_bounds = array<i64: 8, 128>}, {pipeline_mode = #tpu.pipeline_mode<synchronous>, transform_indices = @transform_3, window_bounds = array<i64: 128, 64>}, {pipeline_mode = #tpu.pipeline_mode<synchronous>, transform_indices = @transform_4, window_bounds = array<i64: 128, 64>}, {pipeline_mode = #tpu.pipeline_mode<synchronous>, transform_indices = @transform_5, window_bounds = array<i64: 64, 64>}, {pipeline_mode = #tpu.pipeline_mode<synchronous>, transform_indices = @transform_6, window_bounds = array<i64: 64, 64>}, {pipeline_mode = #tpu.pipeline_mode<synchronous>, transform_indices = @transform_7, window_bounds = array<i64: 64, 64>}, {pipeline_mode = #tpu.pipeline_mode<synchronous>, transform_indices = @transform_8, window_bounds = array<i64: 64, 64>}, {pipeline_mode = #tpu.pipeline_mode<synchronous>, transform_indices = @transform_9, window_bounds = array<i64: 64, 3>}, {pipeline_mode = #tpu.pipeline_mode<synchronous>, transform_indices = @transform_10, window_bounds = array<i64: 2, 128>}, {pipeline_mode = #tpu.pipeline_mode<synchronous>, transform_indices = @transform_11, window_bounds = array<i64: 11, 64>}, {pipeline_mode = #tpu.pipeline_mode<synchronous>, transform_indices = @transform_12, window_bounds = array<i64: 1, 3>}, {transform_indices = @transform_13, window_bounds = array<i64: 32, 3>}]} {
    %c0 = arith.constant 0 : index
    %c0_0 = arith.constant 0 : index
    %0 = vector.load %arg1[%c0, %c0_0] : memref<32x128xbf16, #tpu.memory_space<vmem>>, vector<32x128xbf16>
    %c0_1 = arith.constant 0 : index
    %c0_2 = arith.constant 0 : index
    %1 = vector.load %arg2[%c0_1, %c0_2] : memref<32x8xbf16, #tpu.memory_space<vmem>>, vector<32x8xbf16>
    %c0_3 = arith.constant 0 : index
    %c0_4 = arith.constant 0 : index
    %2 = vector.load %arg11[%c0_3, %c0_4] : memref<2x128xf32, #tpu.memory_space<vmem>>, vector<2x128xf32>
    %c0_5 = arith.constant 0 : index
    %c0_6 = arith.constant 0 : index
    %3 = vector.load %arg12[%c0_5, %c0_6] : memref<11x64xf32, #tpu.memory_space<vmem>>, vector<11x64xf32>
    %c0_7 = arith.constant 0 : index
    %c0_8 = arith.constant 0 : index
    %4 = vector.load %arg3[%c0_7, %c0_8] : memref<8x128xbf16, #tpu.memory_space<vmem>>, vector<8x128xbf16>
    %cst = arith.constant dense<0.000000e+00> : vector<32x128xf32>
    %5 = tpu.matmul %1, %4, %cst {dimension_numbers = #tpu.dot_dimension_numbers<[1], [0], [0], [1], [0, 0, 1, 1], [], []>} : vector<32x8xbf16>, vector<8x128xbf16>, vector<32x128xf32> -> vector<32x128xf32>
    %c64_i32 = arith.constant 64 : i32
    %6 = tpu.dynamic_rotate %5 by %c64_i32 dim 1 : vector<32x128xf32>, i32 -> vector<32x128xf32>
    %7 = arith.subf %5, %6 : vector<32x128xf32>
    %cst_9 = arith.constant 5.000000e-01 : f32
    %8 = vector.broadcast %cst_9 : f32 to vector<32x128xf32>
    %9 = arith.mulf %7, %8 : vector<32x128xf32>
    %10 = vector.extract_strided_slice %2 {offsets = [0, 0], sizes = [1, 128], strides = [1, 1]} : vector<2x128xf32> to vector<1x128xf32>
    %11 = vector.extract_strided_slice %2 {offsets = [1, 0], sizes = [1, 128], strides = [1, 1]} : vector<2x128xf32> to vector<1x128xf32>
    %12 = arith.mulf %9, %9 : vector<32x128xf32>
    %cst_10 = arith.constant 9.99999974E-6 : f32
    %13 = vector.broadcast %cst_10 : f32 to vector<32x128xf32>
    %14 = arith.addf %12, %13 : vector<32x128xf32>
    %15 = math.rsqrt %14 : vector<32x128xf32>
    %16 = arith.mulf %9, %15 : vector<32x128xf32>
    %17 = vector.broadcast %10 : vector<1x128xf32> to vector<32x128xf32>
    %18 = arith.mulf %16, %17 : vector<32x128xf32>
    %19 = vector.broadcast %11 : vector<1x128xf32> to vector<32x128xf32>
    %20 = arith.addf %18, %19 : vector<32x128xf32>
    %cst_11 = arith.constant 0.000000e+00 : f32
    %21 = vector.broadcast %cst_11 : f32 to vector<32x128xf32>
    %22 = arith.maximumf %20, %21 : vector<32x128xf32>
    %c0_12 = arith.constant 0 : index
    %c0_13 = arith.constant 0 : index
    %23 = vector.load %arg4[%c0_12, %c0_13] : memref<128x64xbf16, #tpu.memory_space<vmem>>, vector<128x64xbf16>
    %cst_14 = arith.constant dense<0.000000e+00> : vector<32x64xf32>
    %24 = tpu.matmul %0, %23, %cst_14 {dimension_numbers = #tpu.dot_dimension_numbers<[1], [0], [0], [1], [0, 0, 1, 1], [], []>} : vector<32x128xbf16>, vector<128x64xbf16>, vector<32x64xf32> -> vector<32x64xf32>
    %25 = arith.truncf %22 : vector<32x128xf32> to vector<32x128xbf16>
    %c0_15 = arith.constant 0 : index
    %c0_16 = arith.constant 0 : index
    %26 = vector.load %arg5[%c0_15, %c0_16] : memref<128x64xbf16, #tpu.memory_space<vmem>>, vector<128x64xbf16>
    %cst_17 = arith.constant dense<0.000000e+00> : vector<32x64xf32>
    %27 = tpu.matmul %25, %26, %cst_17 {dimension_numbers = #tpu.dot_dimension_numbers<[1], [0], [0], [1], [0, 0, 1, 1], [], []>} : vector<32x128xbf16>, vector<128x64xbf16>, vector<32x64xf32> -> vector<32x64xf32>
    %28 = arith.addf %24, %27 : vector<32x64xf32>
    %29 = vector.extract_strided_slice %3 {offsets = [0, 0], sizes = [1, 64], strides = [1, 1]} : vector<11x64xf32> to vector<1x64xf32>
    %30 = vector.broadcast %29 : vector<1x64xf32> to vector<32x64xf32>
    %31 = arith.addf %28, %30 : vector<32x64xf32>
    %cst_18 = arith.constant dense<0.000000e+00> : vector<32xf32>
    %32 = vector.multi_reduction <add>, %31, %cst_18 [1] : vector<32x64xf32> to vector<32xf32>
    %33 = vector.shape_cast %32 : vector<32xf32> to vector<32x1xf32>
    %cst_19 = arith.constant 6.400000e+01 : f32
    %34 = vector.broadcast %cst_19 : f32 to vector<32x1xf32>
    %35 = arith.divf %33, %34 : vector<32x1xf32>
    %36 = vector.broadcast %35 : vector<32x1xf32> to vector<32x64xf32>
    %37 = arith.subf %31, %36 : vector<32x64xf32>
    %38 = arith.mulf %37, %37 : vector<32x64xf32>
    %cst_20 = arith.constant dense<0.000000e+00> : vector<32xf32>
    %39 = vector.multi_reduction <add>, %38, %cst_20 [1] : vector<32x64xf32> to vector<32xf32>
    %40 = vector.shape_cast %39 : vector<32xf32> to vector<32x1xf32>
    %cst_21 = arith.constant 6.400000e+01 : f32
    %41 = vector.broadcast %cst_21 : f32 to vector<32x1xf32>
    %42 = arith.divf %40, %41 : vector<32x1xf32>
    %43 = vector.broadcast %35 : vector<32x1xf32> to vector<32x64xf32>
    %44 = arith.subf %31, %43 : vector<32x64xf32>
    %cst_22 = arith.constant 9.99999974E-6 : f32
    %45 = vector.broadcast %cst_22 : f32 to vector<32x1xf32>
    %46 = arith.addf %42, %45 : vector<32x1xf32>
    %47 = math.rsqrt %46 : vector<32x1xf32>
    %48 = vector.broadcast %47 : vector<32x1xf32> to vector<32x64xf32>
    %49 = arith.mulf %44, %48 : vector<32x64xf32>
    %50 = vector.extract_strided_slice %3 {offsets = [1, 0], sizes = [1, 64], strides = [1, 1]} : vector<11x64xf32> to vector<1x64xf32>
    %51 = vector.broadcast %50 : vector<1x64xf32> to vector<32x64xf32>
    %52 = arith.mulf %49, %51 : vector<32x64xf32>
    %53 = vector.extract_strided_slice %3 {offsets = [2, 0], sizes = [1, 64], strides = [1, 1]} : vector<11x64xf32> to vector<1x64xf32>
    %54 = vector.broadcast %53 : vector<1x64xf32> to vector<32x64xf32>
    %55 = arith.addf %52, %54 : vector<32x64xf32>
    %cst_23 = arith.constant 0.000000e+00 : f32
    %56 = vector.broadcast %cst_23 : f32 to vector<32x64xf32>
    %57 = arith.maximumf %55, %56 : vector<32x64xf32>
    %c0_24 = arith.constant 0 : index
    %c0_25 = arith.constant 0 : index
    %58 = vector.load %arg6[%c0_24, %c0_25] : memref<64x64xf32, #tpu.memory_space<vmem>>, vector<64x64xf32>
    %cst_26 = arith.constant dense<0.000000e+00> : vector<32x64xf32>
    %59 = tpu.matmul %57, %58, %cst_26 {dimension_numbers = #tpu.dot_dimension_numbers<[1], [0], [0], [1], [0, 0, 1, 1], [], []>} : vector<32x64xf32>, vector<64x64xf32>, vector<32x64xf32> -> vector<32x64xf32>
    %60 = vector.extract_strided_slice %3 {offsets = [3, 0], sizes = [1, 64], strides = [1, 1]} : vector<11x64xf32> to vector<1x64xf32>
    %61 = vector.broadcast %60 : vector<1x64xf32> to vector<32x64xf32>
    %62 = arith.addf %59, %61 : vector<32x64xf32>
    %c0_27 = arith.constant 0 : index
    %c0_28 = arith.constant 0 : index
    %63 = vector.load %arg7[%c0_27, %c0_28] : memref<64x64xf32, #tpu.memory_space<vmem>>, vector<64x64xf32>
    %cst_29 = arith.constant dense<0.000000e+00> : vector<32x64xf32>
    %64 = tpu.matmul %57, %63, %cst_29 {dimension_numbers = #tpu.dot_dimension_numbers<[1], [0], [0], [1], [0, 0, 1, 1], [], []>} : vector<32x64xf32>, vector<64x64xf32>, vector<32x64xf32> -> vector<32x64xf32>
    %65 = vector.extract_strided_slice %3 {offsets = [4, 0], sizes = [1, 64], strides = [1, 1]} : vector<11x64xf32> to vector<1x64xf32>
    %66 = vector.broadcast %65 : vector<1x64xf32> to vector<32x64xf32>
    %67 = arith.addf %64, %66 : vector<32x64xf32>
    %68 = arith.subf %62, %67 : vector<32x64xf32>
    %cst_30 = arith.constant 5.000000e-01 : f32
    %69 = vector.broadcast %cst_30 : f32 to vector<32x64xf32>
    %70 = arith.mulf %68, %69 : vector<32x64xf32>
    %71 = vector.extract_strided_slice %3 {offsets = [5, 0], sizes = [1, 64], strides = [1, 1]} : vector<11x64xf32> to vector<1x64xf32>
    %72 = vector.extract_strided_slice %3 {offsets = [6, 0], sizes = [1, 64], strides = [1, 1]} : vector<11x64xf32> to vector<1x64xf32>
    %73 = arith.mulf %70, %70 : vector<32x64xf32>
    %cst_31 = arith.constant 9.99999974E-6 : f32
    %74 = vector.broadcast %cst_31 : f32 to vector<32x64xf32>
    %75 = arith.addf %73, %74 : vector<32x64xf32>
    %76 = math.rsqrt %75 : vector<32x64xf32>
    %77 = arith.mulf %70, %76 : vector<32x64xf32>
    %78 = vector.broadcast %71 : vector<1x64xf32> to vector<32x64xf32>
    %79 = arith.mulf %77, %78 : vector<32x64xf32>
    %80 = vector.broadcast %72 : vector<1x64xf32> to vector<32x64xf32>
    %81 = arith.addf %79, %80 : vector<32x64xf32>
    %cst_32 = arith.constant 0.000000e+00 : f32
    %82 = vector.broadcast %cst_32 : f32 to vector<32x64xf32>
    %83 = arith.maximumf %81, %82 : vector<32x64xf32>
    %c0_33 = arith.constant 0 : index
    %c0_34 = arith.constant 0 : index
    %84 = vector.load %arg8[%c0_33, %c0_34] : memref<64x64xf32, #tpu.memory_space<vmem>>, vector<64x64xf32>
    %cst_35 = arith.constant dense<0.000000e+00> : vector<32x64xf32>
    %85 = tpu.matmul %83, %84, %cst_35 {dimension_numbers = #tpu.dot_dimension_numbers<[1], [0], [0], [1], [0, 0, 1, 1], [], []>} : vector<32x64xf32>, vector<64x64xf32>, vector<32x64xf32> -> vector<32x64xf32>
    %86 = vector.extract_strided_slice %3 {offsets = [7, 0], sizes = [1, 64], strides = [1, 1]} : vector<11x64xf32> to vector<1x64xf32>
    %87 = vector.broadcast %86 : vector<1x64xf32> to vector<32x64xf32>
    %88 = arith.addf %85, %87 : vector<32x64xf32>
    %c0_36 = arith.constant 0 : index
    %c0_37 = arith.constant 0 : index
    %89 = vector.load %arg9[%c0_36, %c0_37] : memref<64x64xf32, #tpu.memory_space<vmem>>, vector<64x64xf32>
    %cst_38 = arith.constant dense<0.000000e+00> : vector<32x64xf32>
    %90 = tpu.matmul %83, %89, %cst_38 {dimension_numbers = #tpu.dot_dimension_numbers<[1], [0], [0], [1], [0, 0, 1, 1], [], []>} : vector<32x64xf32>, vector<64x64xf32>, vector<32x64xf32> -> vector<32x64xf32>
    %91 = vector.extract_strided_slice %3 {offsets = [8, 0], sizes = [1, 64], strides = [1, 1]} : vector<11x64xf32> to vector<1x64xf32>
    %92 = vector.broadcast %91 : vector<1x64xf32> to vector<32x64xf32>
    %93 = arith.addf %90, %92 : vector<32x64xf32>
    %94 = arith.subf %88, %93 : vector<32x64xf32>
    %cst_39 = arith.constant 5.000000e-01 : f32
    %95 = vector.broadcast %cst_39 : f32 to vector<32x64xf32>
    %96 = arith.mulf %94, %95 : vector<32x64xf32>
    %97 = vector.extract_strided_slice %3 {offsets = [9, 0], sizes = [1, 64], strides = [1, 1]} : vector<11x64xf32> to vector<1x64xf32>
    %98 = vector.extract_strided_slice %3 {offsets = [10, 0], sizes = [1, 64], strides = [1, 1]} : vector<11x64xf32> to vector<1x64xf32>
    %99 = arith.mulf %96, %96 : vector<32x64xf32>
    %cst_40 = arith.constant 9.99999974E-6 : f32
    %100 = vector.broadcast %cst_40 : f32 to vector<32x64xf32>
    %101 = arith.addf %99, %100 : vector<32x64xf32>
    %102 = math.rsqrt %101 : vector<32x64xf32>
    %103 = arith.mulf %96, %102 : vector<32x64xf32>
    %104 = vector.broadcast %97 : vector<1x64xf32> to vector<32x64xf32>
    %105 = arith.mulf %103, %104 : vector<32x64xf32>
    %106 = vector.broadcast %98 : vector<1x64xf32> to vector<32x64xf32>
    %107 = arith.addf %105, %106 : vector<32x64xf32>
    %108 = arith.addf %107, %57 : vector<32x64xf32>
    %cst_41 = arith.constant 0.000000e+00 : f32
    %109 = vector.broadcast %cst_41 : f32 to vector<32x64xf32>
    %110 = arith.maximumf %108, %109 : vector<32x64xf32>
    %c0_42 = arith.constant 0 : index
    %c0_43 = arith.constant 0 : index
    %111 = vector.load %arg10[%c0_42, %c0_43] : memref<64x3xf32, #tpu.memory_space<vmem>>, vector<64x3xf32>
    %cst_44 = arith.constant dense<0.000000e+00> : vector<32x3xf32>
    %112 = tpu.matmul %110, %111, %cst_44 {dimension_numbers = #tpu.dot_dimension_numbers<[1], [0], [0], [1], [0, 0, 1, 1], [], []>} : vector<32x64xf32>, vector<64x3xf32>, vector<32x3xf32> -> vector<32x3xf32>
    %c0_45 = arith.constant 0 : index
    %c0_46 = arith.constant 0 : index
    %113 = vector.load %arg13[%c0_45, %c0_46] : memref<1x3xf32, #tpu.memory_space<vmem>>, vector<1x3xf32>
    %114 = vector.broadcast %113 : vector<1x3xf32> to vector<32x3xf32>
    %115 = arith.addf %112, %114 : vector<32x3xf32>
    %c0_47 = arith.constant 0 : index
    %c0_48 = arith.constant 0 : index
    %116 = vector.load %arg14[%c0_47, %c0_48] : memref<32x3xf32, #tpu.memory_space<vmem>>, vector<32x3xf32>
    tpu.vector_store %arg14[%c0_47, %c0_48], %115 {strides = array<i32>} : memref<32x3xf32, #tpu.memory_space<vmem>>, vector<32x3xf32>,
    return
  }
  func.func @transform_0(%arg0: i32) -> (i32, i32) {
    %c0_i32 = arith.constant 0 : i32
    %c0_i32_0 = arith.constant 0 : i32
    return %arg0, %c0_i32 : i32, i32
  }
  func.func @transform_1(%arg0: i32) -> (i32, i32) {
    %c0_i32 = arith.constant 0 : i32
    %c0_i32_0 = arith.constant 0 : i32
    return %arg0, %c0_i32 : i32, i32
  }
  func.func @transform_2(%arg0: i32) -> (i32, i32) {
    %c0_i32 = arith.constant 0 : i32
    %c0_i32_0 = arith.constant 0 : i32
    %c0_i32_1 = arith.constant 0 : i32
    return %c0_i32, %c0_i32_0 : i32, i32
  }
  func.func @transform_3(%arg0: i32) -> (i32, i32) {
    %c0_i32 = arith.constant 0 : i32
    %c0_i32_0 = arith.constant 0 : i32
    %c0_i32_1 = arith.constant 0 : i32
    return %c0_i32, %c0_i32_0 : i32, i32
  }
  func.func @transform_4(%arg0: i32) -> (i32, i32) {
    %c0_i32 = arith.constant 0 : i32
    %c0_i32_0 = arith.constant 0 : i32
    %c0_i32_1 = arith.constant 0 : i32
    return %c0_i32, %c0_i32_0 : i32, i32
  }
  func.func @transform_5(%arg0: i32) -> (i32, i32) {
    %c0_i32 = arith.constant 0 : i32
    %c0_i32_0 = arith.constant 0 : i32
    %c0_i32_1 = arith.constant 0 : i32
    return %c0_i32, %c0_i32_0 : i32, i32
  }
  func.func @transform_6(%arg0: i32) -> (i32, i32) {
    %c0_i32 = arith.constant 0 : i32
    %c0_i32_0 = arith.constant 0 : i32
    %c0_i32_1 = arith.constant 0 : i32
    return %c0_i32, %c0_i32_0 : i32, i32
  }
  func.func @transform_7(%arg0: i32) -> (i32, i32) {
    %c0_i32 = arith.constant 0 : i32
    %c0_i32_0 = arith.constant 0 : i32
    %c0_i32_1 = arith.constant 0 : i32
    return %c0_i32, %c0_i32_0 : i32, i32
  }
  func.func @transform_8(%arg0: i32) -> (i32, i32) {
    %c0_i32 = arith.constant 0 : i32
    %c0_i32_0 = arith.constant 0 : i32
    %c0_i32_1 = arith.constant 0 : i32
    return %c0_i32, %c0_i32_0 : i32, i32
  }
  func.func @transform_9(%arg0: i32) -> (i32, i32) {
    %c0_i32 = arith.constant 0 : i32
    %c0_i32_0 = arith.constant 0 : i32
    %c0_i32_1 = arith.constant 0 : i32
    return %c0_i32, %c0_i32_0 : i32, i32
  }
  func.func @transform_10(%arg0: i32) -> (i32, i32) {
    %c0_i32 = arith.constant 0 : i32
    %c0_i32_0 = arith.constant 0 : i32
    %c0_i32_1 = arith.constant 0 : i32
    return %c0_i32, %c0_i32_0 : i32, i32
  }
  func.func @transform_11(%arg0: i32) -> (i32, i32) {
    %c0_i32 = arith.constant 0 : i32
    %c0_i32_0 = arith.constant 0 : i32
    %c0_i32_1 = arith.constant 0 : i32
    return %c0_i32, %c0_i32_0 : i32, i32
  }
  func.func @transform_12(%arg0: i32) -> (i32, i32) {
    %c0_i32 = arith.constant 0 : i32
    %c0_i32_0 = arith.constant 0 : i32
    %c0_i32_1 = arith.constant 0 : i32
    return %c0_i32, %c0_i32_0 : i32, i32
  }
  func.func @transform_13(%arg0: i32) -> (i32, i32) {
    %c0_i32 = arith.constant 0 : i32
    %c0_i32_0 = arith.constant 0 : i32
    return %arg0, %c0_i32 : i32, i32
  }
}

</mosaic_0001>

<bundles_post_ra>
// kernel: tpu_custom_call.1
= control target key start
LH: loop header
LB: loop body
LE: loop exit
PB: predicated region body
PF: predicated region fallthrough
CT: control target
= control target key end

     0   :  { %18 = vsyncpa [#allocation3], 0  ;;  %s1085_s28 = smov [#allocation2]   ;;  %s1086_s30 = smov 128   ;;  %s1447_s0 = inlined_call_operand.vmem [shape: bf16[32,128], index: 0, kind: input, shape index: {}]   ;;  %s1448_s1 = inlined_call_operand.vmem [shape: bf16[32,8], index: 1, kind: input, shape index: {}]   ;;  %s1449_s2 = inlined_call_operand.vmem [shape: bf16[8,128], index: 2, kind: input, shape index: {}]   ;;  %s1450_s3 = inlined_call_operand.vmem [shape: bf16[128,64], index: 3, kind: input, shape index: {}]   ;;  %s1451_s4 = inlined_call_operand.vmem [shape: bf16[128,64], index: 4, kind: input, shape index: {}]   ;;  %s1452_s5 = inlined_call_operand.vmem [shape: f32[64,64], index: 5, kind: input, shape index: {}]   ;;  %s1453_s6 = inlined_call_operand.vmem [shape: f32[64,64], index: 6, kind: input, shape index: {}]   ;;  %s1454_s7 = inlined_call_operand.vmem [shape: f32[64,64], index: 7, kind: input, shape index: {}]   ;;  %s1455_s8 = inlined_call_operand.hbm [shape: f32[64,64], index: 8, kind: input, shape index: {}]   ;;  %s1456_s9 = inlined_call_operand.vmem [shape: f32[64,3], index: 9, kind: input, shape index: {}]   ;;  %s1457_s10 = inlined_call_operand.vmem [shape: f32[2,128], index: 10, kind: input, shape index: {}]   ;;  %s1458_s11 = inlined_call_operand.vmem [shape: f32[11,64], index: 11, kind: input, shape index: {}]   ;;  %s1459_s12 = inlined_call_operand.vmem [shape: f32[1,3], index: 12, kind: input, shape index: {}]   ;;  %s1460_s13 = inlined_call_operand.vmem [shape: f32[32,3], index: 13, kind: output, shape index: {}]  }
   0x1   :  { %s39_s27 = sshll.u32 %s1455_s8, 4  ;;  %s41_s29 = sshll.u32 %s1085_s28, 4  ;;  %s40_s27 = int_to_ptr.hbm [resolvable:$true] %s39_s27  ;;  %s42_s29 = int_to_ptr.vmem [resolvable:$true] %s41_s29 }
   0x2   :  { %s1087_s14 = smov 8  }
   0x3   :  { %47 = dma.hbm_to_vmem [thread:$0]  %s40_s27, 1024, %s42_s29, [#allocation3], %s1086_s30, %s1086_s30, %s1087_s14  }
   0x4   :  { %1083 = dma.done.wait [#allocation3], 1024  }
   0x5   :  { %1084 = vsyncadd [#allocation3], 4294966272  ;;  %vm90_vm0 = vcmask 1043456   ;;  %v72_v0 = vld [vmem:[%s1449_s2] sm:$0xf]  ;;  %vm83_vm1 = vcmask 64512  }
   0x6   :  { %v92_v1 = vsel %vm90_vm0, %v72_v0, 0  ;;  %v985_v2 = vld [vmem:[%s1448_s1] sm:$0xff]  ;;  %v986_v3 = vld [vmem:[%s1448_s1 + $0x8] sm:$0xff]  ;;  %v994_v4 = vld [vmem:[%s1450_s3 + $0x38] sm:$0xff]  ;;  %s1088_s2 = smov 64   ;;  %vm380_vm14 = vcmask 523264  }
   0x7   :  { %101 = vmatpush.bf16.msra.mxu0 %v92_v1  ;;  %356 = vmatpush.bf16.msra.mxu2 %v994_v4  ;;  %v993_v9 = vld [vmem:[%s1450_s3 + $0x30] sm:$0xff]  ;;  %v992_v10 = vld [vmem:[%s1450_s3 + $0x28] sm:$0xff]  ;;  %v991_v11 = vld [vmem:[%s1450_s3 + $0x20] sm:$0xff] }
   0x8   :  { %v1002_v12 = vld [vmem:[%s1451_s4 + $0x38] sm:$0xff]  ;;  %v1001_v14 = vld [vmem:[%s1451_s4 + $0x30] sm:$0xff]  ;;  %v1000_v16 = vld [vmem:[%s1451_s4 + $0x28] sm:$0xff] }
   0x9   :  { %v990_v13 = vld [vmem:[%s1450_s3 + $0x18] sm:$0xff]  ;;  %1003 = vmatpush.bf16.msra.mxu1 %v1002_v12  ;;  %v989_v15 = vld [vmem:[%s1450_s3 + $0x10] sm:$0xff]  ;;  %v988_v17 = vld [vmem:[%s1450_s3 + $0x8] sm:$0xff] }
   0xa   :  { %889 = vmatmul.msk.bf16.vlgmr.msra.gmra.mxu0 %vm83_vm1, %v985_v2  ;;  %v999_v18 = vld [vmem:[%s1451_s4 + $0x20] sm:$0xff]  ;;  %v998_v20 = vld [vmem:[%s1451_s4 + $0x18] sm:$0xff]  ;;  %v997_v23 = vld [vmem:[%s1451_s4 + $0x10] sm:$0xff] }
   0xb   :  { %357 = vmatpush.bf16.msra.mxu2 %v993_v9  ;;  %277 = vmatpush.bf16.msrb.mxu0 %v1002_v12  ;;  %v987_v19 = vld [vmem:[%s1450_s3] sm:$0xff]  ;;  %v996_v26 = vld [vmem:[%s1451_s4 + $0x8] sm:$0xff] }
   0xc   :  { %v983_v21 = vld [vmem:[%s1447_s0] sm:$0xff]  ;;  %v984_v34 = vld [vmem:[%s1447_s0 + $0x8] sm:$0xff] }
   0xd   :  { %1004 = vmatpush.bf16.msra.mxu1 %v1001_v14  ;;  %v995_v30 = vld [vmem:[%s1451_s4] sm:$0xff] }
   0xe   :  { %v69_v51 = vld [vmem:[%s1457_s10] sm:$0x3] }
   0xf   :  { %358 = vmatpush.bf16.msra.mxu2 %v992_v10  ;;  %278 = vmatpush.bf16.msrb.mxu0 %v1001_v14  ;;  %v181_v56 = vperm.slane %v69_v51, 0  ;;  %v186_v1 = vperm.slane %v69_v51, 1 }
  0x11   :  { %1005 = vmatpush.bf16.msra.mxu1 %v1000_v16 }
  0x13   :  { %359 = vmatpush.bf16.msra.mxu2 %v991_v11  ;;  %279 = vmatpush.bf16.msrb.mxu0 %v1000_v16 }
  0x15   :  { %1006 = vmatpush.bf16.msra.mxu1 %v999_v18 }
  0x17   :  { %360 = vmatpush.bf16.msra.mxu2 %v990_v13  ;;  %280 = vmatpush.bf16.msrb.mxu0 %v999_v18 }
  0x19   :  { %1007 = vmatpush.bf16.msra.mxu1 %v998_v20 }
  0x1a   :  { %890 = vmatmul.msk.bf16.gmra.mxu0 %vm83_vm1, %v986_v3 }
  0x1b   :  { %361 = vmatpush.bf16.msra.mxu2 %v989_v15  ;;  %281 = vmatpush.bf16.msrb.mxu0 %v998_v20 }
  0x1d   :  { %1008 = vmatpush.bf16.msra.mxu1 %v997_v23 }
  0x1f   :  { %362 = vmatpush.bf16.msra.mxu2 %v988_v17  ;;  %282 = vmatpush.bf16.msrb.mxu0 %v997_v23 }
  0x21   :  { %1009 = vmatpush.bf16.msra.mxu1 %v996_v26 }
  0x23   :  { %363 = vmatpush.bf16.msra.mxu2 %v987_v19  ;;  %283 = vmatpush.bf16.msrb.mxu0 %v996_v26 }
  0x25   :  { %1010 = vmatpush.bf16.msra.mxu1 %v995_v30 }
  0x26   :  { %364 = vmatmul.bf16.vlgmr.msra.gmra.mxu2 %v983_v21 }
  0x27   :  { %284 = vmatpush.bf16.msrb.mxu0 %v995_v30 }
  0x36   :  { %369 = vmatmul.bf16.gmra.mxu2 %v984_v34 }
  0x87   :  { %v103_v5 = vpop.f32.mrf.mxu0 }
  0x88   :  { %113 = vrot.lane.b32.xlu0 %v103_v5, %s1088_s2 }
  0x8f   :  { %v105_v6 = vpop.f32.mrf.mxu0 }
  0x90   :  { %115 = vrot.lane.b32.xlu0 %v105_v6, %s1088_s2 }
  0x97   :  { %v1175_v7 = vpop.f32.mrf.mxu0 }
  0x98   :  { %117 = vrot.lane.b32.xlu1 %v1175_v7, %s1088_s2 }
  0x9f   :  { %v1178_v8 = vpop.f32.mrf.mxu0 }
  0xa0   :  { %119 = vrot.lane.b32.xlu1 %v1178_v8, %s1088_s2 }
  0xfa   :  { %v114_v22 = vpop.permute.xlu0 %113 }
  0xfb   :  { %v121_v24 = vsub.f32 %v103_v5, %v114_v22 }
  0xfd   :  { %v125_v25 = vmul.f32 0.5, %v121_v24 }
  0xff   :  { %v129_v27 = vmul.f32 %v125_v25, %v125_v25 }
 0x101   :  { %v133_v28 = vadd.f32 1e-05, %v129_v27 }
 0x102   :  { %v116_v29 = vpop.permute.xlu0 %115 }
 0x103   :  { %1025 = vrsqrt.f32 %v133_v28  ;;  %v122_v31 = vsub.f32 %v105_v6, %v116_v29  ;;  %vm143_vm3 = vweird.f32 %v133_v28 }
 0x105   :  { %v126_v32 = vmul.f32 0.5, %v122_v31  ;;  %v365_v31 = vpop.f32.mrf.mxu2 }
 0x107   :  { %v130_v33 = vmul.f32 %v126_v32, %v126_v32 }
 0x109   :  { %v1026_v35 = vpop.eup %1025  ;;  %v134_v36 = vadd.f32 1e-05, %v130_v33 }
 0x10a   :  { %v138_v37 = vmul.f32 %v1026_v35, %v133_v28  ;;  %v118_v38 = vpop.permute.xlu1 %117  ;;  %vm144_vm2 = vweird.f32 %v1026_v35 }
 0x10b   :  { %1027 = vrsqrt.f32 %v134_v36  ;;  %v123_v39 = vsub.f32 %v1175_v7, %v118_v38  ;;  %vm145_vm4 = vmor %vm143_vm3, %vm144_vm2  ;;  %vm153_vm6 = vweird.f32 %v134_v36 }
 0x10c   :  { %v139_v40 = vmul.f32 %v1026_v35, %v138_v37 }
 0x10d   :  { %v127_v41 = vmul.f32 0.5, %v123_v39  ;;  %v367_v37 = vpop.f32.mrf.mxu2 }
 0x10e   :  { %v140_v42 = vmul.f32 0.5, %v139_v40 }
 0x10f   :  { %v131_v43 = vmul.f32 %v127_v41, %v127_v41 }
 0x110   :  { %v141_v44 = vsub.f32 1.5, %v140_v42 }
 0x111   :  { %v1028_v45 = vpop.eup %1027  ;;  %v135_v46 = vadd.f32 1e-05, %v131_v43 }
 0x112   :  { %v142_v47 = vmul.f32 %v1026_v35, %v141_v44  ;;  %v148_v48 = vmul.f32 %v1028_v45, %v134_v36  ;;  %v120_v49 = vpop.permute.xlu1 %119  ;;  %vm154_vm5 = vweird.f32 %v1028_v45 }
 0x113   :  { %1029 = vrsqrt.f32 %v135_v46  ;;  %v124_v50 = vsub.f32 %v1178_v8, %v120_v49  ;;  %vm155_vm7 = vmor %vm153_vm6, %vm154_vm5  ;;  %vm163_vm9 = vweird.f32 %v135_v46 }
 0x114   :  { %v146_v52 = vsel %vm145_vm4, %v1026_v35, %v142_v47  ;;  %v149_v53 = vmul.f32 %v1028_v45, %v148_v48 }
 0x115   :  { %v128_v54 = vmul.f32 0.5, %v124_v50  ;;  %v177_v57 = vmul.f32 %v146_v52, %v125_v25  ;;  %v370_v43 = vpop.f32.mrf.mxu2 }
 0x116   :  { %v150_v55 = vmul.f32 0.5, %v149_v53  ;;  %v1089_v53 = vmov 64.0  }
 0x117   :  { %v132_v58 = vmul.f32 %v128_v54, %v128_v54  ;;  %v182_v0 = vmul.f32 %v181_v56, %v177_v57 }
 0x118   :  { %v151_v59 = vsub.f32 1.5, %v150_v55 }
 0x119   :  { %v1030_v60 = vpop.eup %1029  ;;  %v136_v61 = vadd.f32 1e-05, %v132_v58  ;;  %v187_v7 = vadd.f32 %v186_v1, %v182_v0 }
 0x11a   :  { %v152_v62 = vmul.f32 %v1028_v45, %v151_v59  ;;  %v158_v63 = vmul.f32 %v1030_v60, %v135_v46  ;;  %vm164_vm8 = vweird.f32 %v1030_v60 }
 0x11b   :  { %1031 = vrsqrt.f32 %v136_v61  ;;  %vm165_vm10 = vmor %vm163_vm9, %vm164_vm8  ;;  %v191_v13 = vmax.f32 %v187_v7, 0.0  ;;  %vm173_vm12 = vweird.f32 %v136_v61 }
 0x11c   :  { %v156_v2 = vsel %vm155_vm7, %v1028_v45, %v152_v62  ;;  %v159_v3 = vmul.f32 %v1030_v60, %v158_v63  ;;  %1033 = vrcp.f32 %v1089_v53 }
 0x11d   :  { %v178_v4 = vmul.f32 %v156_v2, %v126_v32  ;;  %v1240_v32 = vld [vmem:[%s1458_s11] sm:$0xff]  ;;  %v372_v48 = vpop.f32.mrf.mxu2 }
 0x11e   :  { %v160_v5 = vmul.f32 0.5, %v159_v3  ;;  %v375_v33 = vperm.slane %v1240_v32, 0 }
 0x11f   :  { %v183_v6 = vmul.f32 %v181_v56, %v178_v4 }
 0x120   :  { %v161_v8 = vsub.f32 1.5, %v160_v5 }
 0x121   :  { %v1032_v9 = vpop.eup %1031  ;;  %v188_v10 = vadd.f32 %v186_v1, %v183_v6 }
 0x122   :  { %v162_v11 = vmul.f32 %v1030_v60, %v161_v8  ;;  %v168_v12 = vmul.f32 %v1032_v9, %v136_v61  ;;  %vm174_vm11 = vweird.f32 %v1032_v9 }
 0x123   :  { %v192_v14 = vmax.f32 %v188_v10, 0.0  ;;  %vm175_vm13 = vmor %vm173_vm12, %vm174_vm11 }
 0x124   :  { %v166_v15 = vsel %vm165_vm10, %v1030_v60, %v162_v11  ;;  %v169_v16 = vmul.f32 %v1032_v9, %v168_v12 }
 0x125   :  { %v211_v17 = vpack.c.bf16 %v192_v14, %v191_v13  ;;  %v179_v19 = vmul.f32 %v166_v15, %v127_v41 }
 0x126   :  { %v170_v18 = vmul.f32 0.5, %v169_v16  ;;  %v497_v16 = vld [vmem:[%s1452_s5 + $0x38] sm:$0xff] }
 0x127   :  { %285 = vmatmul.bf16.vlgmr.msrb.gmra.mxu0 %v211_v17  ;;  %v184_v22 = vmul.f32 %v181_v56, %v179_v19  ;;  %v547_v17 = vld [vmem:[%s1453_s6 + $0x38] sm:$0xff]  ;;  %519 = vmatpush.msra.mxu3 %v497_v16  ;;  %v546_v19 = vld [vmem:[%s1453_s6 + $0x30] sm:$0xff] }
 0x128   :  { %v171_v20 = vsub.f32 1.5, %v170_v18  ;;  %557 = vmatpush.msra.mxu0 %v547_v17  ;;  %v496_v18 = vld [vmem:[%s1452_s5 + $0x30] sm:$0xff] }
 0x129   :  { %v189_v26 = vadd.f32 %v186_v1, %v184_v22  ;;  %520 = vmatpush.msra.mxu3 %v496_v18  ;;  %v494_v22 = vld [vmem:[%s1452_s5 + $0x20] sm:$0xff] }
 0x12a   :  { %v172_v21 = vmul.f32 %v1032_v9, %v171_v20  ;;  %558 = vmatpush.msra.mxu0 %v546_v19  ;;  %v495_v20 = vld [vmem:[%s1452_s5 + $0x28] sm:$0xff] }
 0x12b   :  { %v193_v28 = vmax.f32 %v189_v26, 0.0  ;;  %521 = vmatpush.msra.mxu3 %v495_v20  ;;  %v492_v26 = vld [vmem:[%s1452_s5 + $0x10] sm:$0xff] }
 0x12c   :  { %v176_v23 = vsel %vm175_vm13, %v1032_v9, %v172_v21  ;;  %v545_v21 = vld [vmem:[%s1453_s6 + $0x28] sm:$0xff] }
 0x12d   :  { %v180_v24 = vmul.f32 %v176_v23, %v128_v54  ;;  %v1034_v54 = vpop.eup %1033  ;;  %559 = vmatpush.msra.mxu0 %v545_v21  ;;  %v544_v23 = vld [vmem:[%s1453_s6 + $0x20] sm:$0xff]  ;;  %522 = vmatpush.msra.mxu3 %v494_v22 }
 0x12e   :  { %v394_v55 = vmul.f32 64.0, %v1034_v54  ;;  %vm398_vm15 = vweird.f32 %v1034_v54 }
 0x12f   :  { %v185_v25 = vmul.f32 %v181_v56, %v180_v24  ;;  %560 = vmatpush.msra.mxu0 %v544_v23  ;;  %v493_v24 = vld [vmem:[%s1452_s5 + $0x18] sm:$0xff] }
 0x130   :  { %v395_v56 = vsub.f32 1.0, %v394_v55  ;;  %523 = vmatpush.msra.mxu3 %v493_v24 }
 0x131   :  { %v190_v27 = vadd.f32 %v186_v1, %v185_v25  ;;  %v543_v25 = vld [vmem:[%s1453_s6 + $0x18] sm:$0xff] }
 0x132   :  { %v396_v57 = vmul.f32 %v1034_v54, %v395_v56  ;;  %561 = vmatpush.msra.mxu0 %v543_v25  ;;  %524 = vmatpush.msra.mxu3 %v492_v26 }
 0x133   :  { %v194_v29 = vmax.f32 %v190_v27, 0.0  ;;  %v542_v27 = vld [vmem:[%s1453_s6 + $0x10] sm:$0xff] }
 0x134   :  { %v397_v58 = vadd.f32 %v1034_v54, %v396_v57  ;;  %562 = vmatpush.msra.mxu0 %v542_v27 }
 0x135   :  { %v212_v30 = vpack.c.bf16 %v194_v29, %v193_v28  ;;  %v491_v28 = vld [vmem:[%s1452_s5 + $0x8] sm:$0xff] }
 0x136   :  { %v1247_v59 = vsel %vm398_vm15, %v1034_v54, %v397_v58  ;;  %v541_v29 = vld [vmem:[%s1453_s6 + $0x8] sm:$0xff]  ;;  %525 = vmatpush.msra.mxu3 %v491_v28  ;;  %v481_v54 = vperm.slane %v1240_v32, 2  ;;  %v659_v28 = vld [vmem:[%s1454_s7 + $0x38] sm:$0xff] }
 0x137   :  { %290 = vmatmul.bf16.vlgmr.msra.gmra.mxu1 %v212_v30  ;;  %563 = vmatpush.msra.mxu0 %v541_v29  ;;  %v490_v30 = vld [vmem:[%s1452_s5] sm:$0xff]  ;;  %v709_v29 = vld [vmem:[#allocation2 + $0x38] sm:$0xff] }
 0x138   :  { %526 = vmatpush.msra.mxu3 %v490_v30  ;;  %719 = vmatpush.msrb.mxu1 %v709_v29  ;;  %v708_v30 = vld [vmem:[#allocation2 + $0x30] sm:$0xff]  ;;  %v643_v29 = vperm.slane %v1240_v32, 6 }
 0x13a   :  { %681 = vmatpush.msrb.mxu3 %v659_v28  ;;  %720 = vmatpush.msrb.mxu1 %v708_v30 }
 0x1a4   :  { %v286_v34 = vpop.f32.mrf.mxu0 }
 0x1a5   :  { %v366_v35 = vadd.f32 %v365_v31, %v286_v34  ;;  %v540_v31 = vld [vmem:[%s1453_s6] sm:$0xff] }
 0x1a6   :  { %564 = vmatpush.msra.mxu0 %v540_v31  ;;  %v657_v31 = vld [vmem:[%s1454_s7 + $0x28] sm:$0xff] }
 0x1a7   :  { %v376_v36 = vadd.f32 %v375_v33, %v366_v35 }
 0x1a9   :  { %v381_v38 = vsel %vm380_vm14, %v376_v36, 0.0 }
 0x1aa   :  { %382 = vadd.xlane.f32.xlu2 %v381_v38 }
 0x1ac   :  { %v288_v39 = vpop.f32.mrf.mxu0 }
 0x1ad   :  { %v368_v40 = vadd.f32 %v367_v37, %v288_v39 }
 0x1af   :  { %v377_v41 = vadd.f32 %v375_v33, %v368_v40 }
 0x1b1   :  { %v384_v42 = vsel %vm380_vm14, %v377_v41, 0.0 }
 0x1b2   :  { %385 = vadd.xlane.f32.xlu2 %v384_v42 }
 0x1b4   :  { %v291_v44 = vpop.f32.mrf.mxu1 }
 0x1b5   :  { %v371_v45 = vadd.f32 %v370_v43, %v291_v44 }
 0x1b7   :  { %v378_v46 = vadd.f32 %v375_v33, %v371_v45 }
 0x1b9   :  { %v387_v47 = vsel %vm380_vm14, %v378_v46, 0.0 }
 0x1ba   :  { %388 = vadd.xlane.f32.xlu0 %v387_v47 }
 0x1bc   :  { %v293_v49 = vpop.f32.mrf.mxu1 }
 0x1bd   :  { %v373_v50 = vadd.f32 %v372_v48, %v293_v49 }
 0x1bf   :  { %v379_v51 = vadd.f32 %v375_v33, %v373_v50  ;;  %v476_v50 = vperm.slane %v1240_v32, 1 }
 0x1c1   :  { %v390_v52 = vsel %vm380_vm14, %v379_v51, 0.0 }
 0x1c2   :  { %391 = vadd.xlane.f32.xlu1 %v390_v52 }
 0x21d   :  { %v383_v60 = vpop.xlane.xlu2 %382 }
 0x21e   :  { %v400_v61 = vmul.f32 %v1247_v59, %v383_v60 }
 0x220   :  { %v1250_v62 = vsub.f32 %v376_v36, %v400_v61 }
 0x222   :  { %v408_v63 = vmul.f32 %v1250_v62, %v1250_v62 }
 0x224   :  { %v412_v0 = vsel %vm380_vm14, %v408_v63, 0.0 }
 0x225   :  { %413 = vadd.xlane.f32.xlu2 %v412_v0  ;;  %v386_v1 = vpop.xlane.xlu2 %385 }
 0x226   :  { %v401_v2 = vmul.f32 %v1247_v59, %v386_v1 }
 0x228   :  { %v1256_v3 = vsub.f32 %v377_v41, %v401_v2 }
 0x22a   :  { %v409_v4 = vmul.f32 %v1256_v3, %v1256_v3 }
 0x22c   :  { %v415_v5 = vsel %vm380_vm14, %v409_v4, 0.0 }
 0x22d   :  { %v389_v6 = vpop.xlane.xlu0 %388  ;;  %416 = vadd.xlane.f32.xlu2 %v415_v5 }
 0x22e   :  { %v402_v7 = vmul.f32 %v1247_v59, %v389_v6 }
 0x230   :  { %v1262_v8 = vsub.f32 %v378_v46, %v402_v7 }
 0x232   :  { %v410_v9 = vmul.f32 %v1262_v8, %v1262_v8 }
 0x234   :  { %v418_v10 = vsel %vm380_vm14, %v410_v9, 0.0 }
 0x235   :  { %v392_v11 = vpop.xlane.xlu1 %391  ;;  %419 = vadd.xlane.f32.xlu2 %v418_v10 }
 0x236   :  { %v403_v12 = vmul.f32 %v1247_v59, %v392_v11 }
 0x238   :  { %v1268_v13 = vsub.f32 %v379_v51, %v403_v12 }
 0x23a   :  { %v411_v14 = vmul.f32 %v1268_v13, %v1268_v13 }
 0x23c   :  { %v421_v15 = vsel %vm380_vm14, %v411_v14, 0.0 }
 0x23d   :  { %422 = vadd.xlane.f32.xlu2 %v421_v15 }
 0x298   :  { %v414_v33 = vpop.xlane.xlu2 %413 }
 0x299   :  { %v424_v34 = vmul.f32 %v414_v33, %v1247_v59  ;;  %v707_v33 = vld [vmem:[#allocation2 + $0x28] sm:$0xff] }
 0x29a   :  { %721 = vmatpush.msrb.mxu1 %v707_v33 }
 0x29b   :  { %v428_v35 = vadd.f32 1e-05, %v424_v34 }
 0x29d   :  { %1035 = vrsqrt.f32 %v428_v35  ;;  %vm438_vm1 = vweird.f32 %v428_v35 }
 0x2a0   :  { %v417_v36 = vpop.xlane.xlu2 %416 }
 0x2a1   :  { %v425_v37 = vmul.f32 %v417_v36, %v1247_v59  ;;  %v706_v36 = vld [vmem:[#allocation2 + $0x20] sm:$0xff] }
 0x2a2   :  { %722 = vmatpush.msrb.mxu1 %v706_v36 }
 0x2a3   :  { %v1036_v38 = vpop.eup %1035  ;;  %v429_v39 = vadd.f32 1e-05, %v425_v37  ;;  %v548_v37 = vperm.slane %v1240_v32, 4 }
 0x2a4   :  { %v433_v40 = vmul.f32 %v1036_v38, %v428_v35  ;;  %vm439_vm0 = vweird.f32 %v1036_v38  ;;  %v656_v35 = vld [vmem:[%s1454_s7 + $0x20] sm:$0xff] }
 0x2a5   :  { %1037 = vrsqrt.f32 %v429_v39  ;;  %vm440_vm2 = vmor %vm438_vm1, %vm439_vm0  ;;  %vm448_vm4 = vweird.f32 %v429_v39 }
 0x2a6   :  { %v434_v41 = vmul.f32 %v1036_v38, %v433_v40  ;;  %v705_v40 = vld [vmem:[#allocation2 + $0x18] sm:$0xff] }
 0x2a7   :  { %723 = vmatpush.msrb.mxu1 %v705_v40 }
 0x2a8   :  { %v435_v42 = vmul.f32 0.5, %v434_v41  ;;  %v420_v43 = vpop.xlane.xlu2 %419  ;;  %v654_v41 = vld [vmem:[%s1454_s7 + $0x10] sm:$0xff] }
 0x2a9   :  { %v426_v44 = vmul.f32 %v420_v43, %v1247_v59 }
 0x2aa   :  { %v436_v45 = vsub.f32 1.5, %v435_v42  ;;  %v704_v42 = vld [vmem:[#allocation2 + $0x10] sm:$0xff] }
 0x2ab   :  { %v1038_v46 = vpop.eup %1037  ;;  %v430_v47 = vadd.f32 1e-05, %v426_v44  ;;  %724 = vmatpush.msrb.mxu1 %v704_v42 }
 0x2ac   :  { %v437_v48 = vmul.f32 %v1036_v38, %v436_v45  ;;  %v443_v49 = vmul.f32 %v1038_v46, %v429_v39  ;;  %vm449_vm3 = vweird.f32 %v1038_v46  ;;  %v655_v39 = vld [vmem:[%s1454_s7 + $0x18] sm:$0xff] }
 0x2ad   :  { %1039 = vrsqrt.f32 %v430_v47  ;;  %vm450_vm5 = vmor %vm448_vm4, %vm449_vm3  ;;  %vm458_vm7 = vweird.f32 %v430_v47 }
 0x2ae   :  { %v441_v51 = vsel %vm440_vm2, %v1036_v38, %v437_v48  ;;  %v444_v52 = vmul.f32 %v1038_v46, %v443_v49  ;;  %v498_v38 = vperm.slane %v1240_v32, 3 }
 0x2af   :  { %v472_v53 = vmul.f32 %v441_v51, %v1250_v62  ;;  %v702_v51 = vld [vmem:[#allocation2] sm:$0xff] }
 0x2b0   :  { %v445_v55 = vmul.f32 0.5, %v444_v52  ;;  %v423_v56 = vpop.xlane.xlu2 %422 }
 0x2b1   :  { %v427_v57 = vmul.f32 %v423_v56, %v1247_v59  ;;  %v477_v58 = vmul.f32 %v476_v50, %v472_v53 }
 0x2b2   :  { %v446_v60 = vsub.f32 1.5, %v445_v55 }
 0x2b3   :  { %v1040_v61 = vpop.eup %1039  ;;  %v431_v63 = vadd.f32 1e-05, %v427_v57  ;;  %v482_v0 = vadd.f32 %v481_v54, %v477_v58 }
 0x2b4   :  { %v447_v1 = vmul.f32 %v1038_v46, %v446_v60  ;;  %v453_v2 = vmul.f32 %v1040_v61, %v430_v47  ;;  %vm459_vm6 = vweird.f32 %v1040_v61  ;;  %v703_v47 = vld [vmem:[#allocation2 + $0x8] sm:$0xff] }
 0x2b5   :  { %1041 = vrsqrt.f32 %v431_v63  ;;  %v1328_v4 = vmax.f32 %v482_v0, 0.0  ;;  %vm460_vm8 = vmor %vm458_vm7, %vm459_vm6  ;;  %vm468_vm10 = vweird.f32 %v431_v63  ;;  %725 = vmatpush.msrb.mxu1 %v703_v47 }
 0x2b6   :  { %v451_v62 = vsel %vm450_vm5, %v1038_v46, %v447_v1  ;;  %v454_v5 = vmul.f32 %v1040_v61, %v453_v2  ;;  %v653_v46 = vld [vmem:[%s1454_s7 + $0x8] sm:$0xff] }
 0x2b7   :  { %963 = vmatmul.msk.f32.vlgmr.msra.gmra.mxu3 %vm380_vm14, %v1328_v4  ;;  %967 = vmatmul.msk.f32.vlgmr.msra.gmra.mxu0 %vm380_vm14, %v1328_v4  ;;  %v473_v59 = vmul.f32 %v451_v62, %v1256_v3 }
 0x2b8   :  { %v455_v6 = vmul.f32 0.5, %v454_v5  ;;  %726 = vmatpush.msrb.mxu1 %v702_v51 }
 0x2b9   :  { %v478_v7 = vmul.f32 %v476_v50, %v473_v59 }
 0x2ba   :  { %v456_v9 = vsub.f32 1.5, %v455_v6 }
 0x2bb   :  { %v1042_v10 = vpop.eup %1041  ;;  %v483_v11 = vadd.f32 %v481_v54, %v478_v7 }
 0x2bc   :  { %v457_v12 = vmul.f32 %v1040_v61, %v456_v9  ;;  %v463_v14 = vmul.f32 %v1042_v10, %v431_v63  ;;  %vm469_vm9 = vweird.f32 %v1042_v10 }
 0x2bd   :  { %v1335_v15 = vmax.f32 %v483_v11, 0.0  ;;  %vm470_vm11 = vmor %vm468_vm10, %vm469_vm9 }
 0x2be   :  { %v461_v16 = vsel %vm460_vm8, %v1040_v61, %v457_v12  ;;  %v464_v17 = vmul.f32 %v1042_v10, %v463_v14 }
 0x2bf   :  { %964 = vmatmul.msk.f32.gmra.mxu3 %vm380_vm14, %v1335_v15  ;;  %968 = vmatmul.msk.f32.gmra.mxu0 %vm380_vm14, %v1335_v15  ;;  %v474_v3 = vmul.f32 %v461_v16, %v1262_v8 }
 0x2c0   :  { %v465_v18 = vmul.f32 0.5, %v464_v17 }
 0x2c1   :  { %v479_v19 = vmul.f32 %v476_v50, %v474_v3 }
 0x2c2   :  { %v466_v20 = vsub.f32 1.5, %v465_v18 }
 0x2c3   :  { %v484_v21 = vadd.f32 %v481_v54, %v479_v19 }
 0x2c4   :  { %v467_v22 = vmul.f32 %v1042_v10, %v466_v20 }
 0x2c5   :  { %v1342_v23 = vmax.f32 %v484_v21, 0.0 }
 0x2c6   :  { %v471_v24 = vsel %vm470_vm11, %v1042_v10, %v467_v22  ;;  %v638_v22 = vperm.slane %v1240_v32, 5 }
 0x2c7   :  { %965 = vmatmul.msk.f32.gmra.mxu3 %vm380_vm14, %v1342_v23  ;;  %969 = vmatmul.msk.f32.gmra.mxu0 %vm380_vm14, %v1342_v23  ;;  %v475_v25 = vmul.f32 %v471_v24, %v1268_v13  ;;  %v658_v13 = vld [vmem:[%s1454_s7 + $0x30] sm:$0xff] }
 0x2c8   :  { %682 = vmatpush.msrb.mxu3 %v658_v13 }
 0x2c9   :  { %v480_v8 = vmul.f32 %v476_v50, %v475_v25  ;;  %v652_v50 = vld [vmem:[%s1454_s7] sm:$0xff] }
 0x2ca   :  { %683 = vmatpush.msrb.mxu3 %v657_v31 }
 0x2cb   :  { %v485_v26 = vadd.f32 %v481_v54, %v480_v8 }
 0x2cc   :  { %684 = vmatpush.msrb.mxu3 %v656_v35 }
 0x2cd   :  { %v1349_v27 = vmax.f32 %v485_v26, 0.0 }
 0x2ce   :  { %685 = vmatpush.msrb.mxu3 %v655_v39 }
 0x2cf   :  { %966 = vmatmul.msk.f32.gmra.mxu3 %vm380_vm14, %v1349_v27  ;;  %970 = vmatmul.msk.f32.gmra.mxu0 %vm380_vm14, %v1349_v27 }
 0x2d0   :  { %686 = vmatpush.msrb.mxu3 %v654_v41 }
 0x2d2   :  { %687 = vmatpush.msrb.mxu3 %v653_v46 }
 0x2d4   :  { %688 = vmatpush.msrb.mxu3 %v652_v50 }
 0x334   :  { %v566_v34 = vpop.f32.mrf.mxu0 }
 0x335   :  { %v567_v44 = vadd.f32 %v566_v34, %v548_v37 }
 0x33a   :  { %v528_v43 = vpop.f32.mrf.mxu3 }
 0x33b   :  { %v529_v45 = vadd.f32 %v528_v43, %v498_v38 }
 0x33c   :  { %v569_v48 = vpop.f32.mrf.mxu0 }
 0x33d   :  { %v578_v49 = vsub.f32 %v529_v45, %v567_v44  ;;  %v570_v56 = vadd.f32 %v569_v48, %v548_v37 }
 0x33f   :  { %v582_v52 = vmul.f32 0.5, %v578_v49 }
 0x341   :  { %v586_v53 = vmul.f32 %v582_v52, %v582_v52 }
 0x342   :  { %v531_v54 = vpop.f32.mrf.mxu3 }
 0x343   :  { %v590_v55 = vadd.f32 1e-05, %v586_v53  ;;  %v532_v57 = vadd.f32 %v531_v54, %v498_v38 }
 0x344   :  { %v572_v60 = vpop.f32.mrf.mxu0 }
 0x345   :  { %1043 = vrsqrt.f32 %v590_v55  ;;  %v579_v58 = vsub.f32 %v532_v57, %v570_v56  ;;  %v573_v62 = vadd.f32 %v572_v60, %v548_v37  ;;  %vm600_vm13 = vweird.f32 %v590_v55 }
 0x347   :  { %v583_v61 = vmul.f32 0.5, %v579_v58 }
 0x349   :  { %v587_v63 = vmul.f32 %v583_v61, %v583_v61 }
 0x34a   :  { %v534_v0 = vpop.f32.mrf.mxu3 }
 0x34b   :  { %v1044_v1 = vpop.eup %1043  ;;  %v591_v2 = vadd.f32 1e-05, %v587_v63  ;;  %v535_v5 = vadd.f32 %v534_v0, %v498_v38 }
 0x34c   :  { %v595_v59 = vmul.f32 %v1044_v1, %v590_v55  ;;  %v575_v11 = vpop.f32.mrf.mxu0  ;;  %vm601_vm12 = vweird.f32 %v1044_v1 }
 0x34d   :  { %1045 = vrsqrt.f32 %v591_v2  ;;  %v580_v6 = vsub.f32 %v535_v5, %v573_v62  ;;  %v576_v18 = vadd.f32 %v575_v11, %v548_v37  ;;  %vm602_vm15 = vmor %vm600_vm13, %vm601_vm12  ;;  %vm610_vm1 = vweird.f32 %v591_v2  ;;  %v825_v62 = vld [vmem:[%s1456_s9 + $0x38] sm:$0xff]  ;;  %v824_v5 = vld [vmem:[%s1456_s9 + $0x30] sm:$0xff] }
 0x34e   :  { %v596_v7 = vmul.f32 %v1044_v1, %v595_v59  ;;  %1011 = vmatpush.msrb.mxu2 %v825_v62  ;;  %850 = vmatpush.msra.mxu1 %v825_v62  ;;  %v1400_v59 = vld [vmem:[%s1458_s11 + $0x8] sm:$0x7]  ;;  %v822_v11 = vld [vmem:[%s1456_s9 + $0x20] sm:$0xff] }
 0x34f   :  { %v584_v9 = vmul.f32 0.5, %v580_v6 }
 0x350   :  { %v597_v10 = vmul.f32 0.5, %v596_v7  ;;  %1012 = vmatpush.msrb.mxu2 %v824_v5  ;;  %851 = vmatpush.msra.mxu1 %v824_v5  ;;  %v823_v7 = vld [vmem:[%s1456_s9 + $0x28] sm:$0xff] }
 0x351   :  { %v588_v12 = vmul.f32 %v584_v9, %v584_v9 }
 0x352   :  { %v598_v14 = vsub.f32 1.5, %v597_v10  ;;  %v537_v16 = vpop.f32.mrf.mxu3  ;;  %1013 = vmatpush.msrb.mxu2 %v823_v7  ;;  %852 = vmatpush.msra.mxu1 %v823_v7  ;;  %v660_v10 = vperm.slane %v1240_v32, 7 }
 0x353   :  { %v1046_v17 = vpop.eup %1045  ;;  %v592_v3 = vadd.f32 1e-05, %v588_v12  ;;  %v538_v19 = vadd.f32 %v537_v16, %v498_v38  ;;  %v821_v12 = vld [vmem:[%s1456_s9 + $0x18] sm:$0xff] }
 0x354   :  { %v599_v20 = vmul.f32 %v1044_v1, %v598_v14  ;;  %v605_v21 = vmul.f32 %v1046_v17, %v591_v2  ;;  %vm611_vm0 = vweird.f32 %v1046_v17  ;;  %1014 = vmatpush.msrb.mxu2 %v822_v11  ;;  %853 = vmatpush.msra.mxu1 %v822_v11 }
 0x355   :  { %1047 = vrsqrt.f32 %v592_v3  ;;  %v581_v24 = vsub.f32 %v538_v19, %v576_v18  ;;  %vm612_vm2 = vmor %vm610_vm1, %vm611_vm0  ;;  %vm620_vm4 = vweird.f32 %v592_v3  ;;  %v819_v19 = vld [vmem:[%s1456_s9 + $0x8] sm:$0xff] }
 0x356   :  { %v603_v25 = vsel %vm602_vm15, %v1044_v1, %v599_v20  ;;  %v606_v8 = vmul.f32 %v1046_v17, %v605_v21  ;;  %1015 = vmatpush.msrb.mxu2 %v821_v12  ;;  %854 = vmatpush.msra.mxu1 %v821_v12  ;;  %v818_v21 = vld [vmem:[%s1456_s9] sm:$0xff] }
 0x357   :  { %v634_v26 = vmul.f32 %v603_v25, %v582_v52  ;;  %v585_v28 = vmul.f32 0.5, %v581_v24 }
 0x358   :  { %v607_v13 = vmul.f32 0.5, %v606_v8 }
 0x359   :  { %v639_v30 = vmul.f32 %v638_v22, %v634_v26  ;;  %v589_v31 = vmul.f32 %v585_v28, %v585_v28 }
 0x35a   :  { %v608_v33 = vsub.f32 1.5, %v607_v13 }
 0x35b   :  { %v1048_v34 = vpop.eup %1047  ;;  %v593_v35 = vadd.f32 1e-05, %v589_v31  ;;  %v644_v36 = vadd.f32 %v643_v29, %v639_v30 }
 0x35c   :  { %v609_v37 = vmul.f32 %v1046_v17, %v608_v33  ;;  %v615_v38 = vmul.f32 %v1048_v34, %v592_v3  ;;  %vm621_vm3 = vweird.f32 %v1048_v34  ;;  %v820_v3 = vld [vmem:[%s1456_s9 + $0x10] sm:$0xff] }
 0x35d   :  { %1049 = vrsqrt.f32 %v593_v35  ;;  %v648_v39 = vmax.f32 %v644_v36, 0.0  ;;  %vm622_vm5 = vmor %vm620_vm4, %vm621_vm3  ;;  %vm630_vm7 = vweird.f32 %v593_v35  ;;  %855 = vmatpush.msra.mxu1 %v820_v3  ;;  %1016 = vmatpush.msrb.mxu2 %v820_v3 }
 0x35e   :  { %v613_v40 = vsel %vm612_vm2, %v1046_v17, %v609_v37  ;;  %v616_v41 = vmul.f32 %v1048_v34, %v615_v38 }
 0x35f   :  { %v635_v42 = vmul.f32 %v613_v40, %v583_v61  ;;  %971 = vmatmul.msk.f32.vlgmr.msrb.gmra.mxu3 %vm380_vm14, %v648_v39  ;;  %975 = vmatmul.msk.f32.vlgmr.msrb.gmra.mxu1 %vm380_vm14, %v648_v39 }
 0x360   :  { %v617_v43 = vmul.f32 0.5, %v616_v41  ;;  %856 = vmatpush.msra.mxu1 %v819_v19  ;;  %1017 = vmatpush.msrb.mxu2 %v819_v19 }
 0x361   :  { %v640_v44 = vmul.f32 %v638_v22, %v635_v42 }
 0x362   :  { %v618_v45 = vsub.f32 1.5, %v617_v43  ;;  %857 = vmatpush.msra.mxu1 %v818_v21  ;;  %1018 = vmatpush.msrb.mxu2 %v818_v21 }
 0x363   :  { %v1050_v46 = vpop.eup %1049  ;;  %v645_v47 = vadd.f32 %v643_v29, %v640_v44 }
 0x364   :  { %v619_v48 = vmul.f32 %v1048_v34, %v618_v45  ;;  %v625_v49 = vmul.f32 %v1050_v46, %v593_v35  ;;  %vm631_vm6 = vweird.f32 %v1050_v46 }
 0x365   :  { %v649_v50 = vmax.f32 %v645_v47, 0.0  ;;  %vm632_vm8 = vmor %vm630_vm7, %vm631_vm6  ;;  %vm871_vm6 = vcmask 23552  }
 0x366   :  { %v623_v51 = vsel %vm622_vm5, %v1048_v34, %v619_v48  ;;  %v626_v52 = vmul.f32 %v1050_v46, %v625_v49 }
 0x367   :  { %v636_v53 = vmul.f32 %v623_v51, %v584_v9  ;;  %972 = vmatmul.msk.f32.gmra.mxu3 %vm380_vm14, %v649_v50  ;;  %976 = vmatmul.msk.f32.gmra.mxu1 %vm380_vm14, %v649_v50  ;;  %v710_v9 = vperm.slane %v1400_v59, 0 }
 0x368   :  { %v627_v54 = vmul.f32 0.5, %v626_v52  ;;  %v800_v52 = vperm.slane %v1400_v59, 1 }
 0x369   :  { %v641_v55 = vmul.f32 %v638_v22, %v636_v53 }
 0x36a   :  { %v628_v56 = vsub.f32 1.5, %v627_v54 }
 0x36b   :  { %v646_v57 = vadd.f32 %v643_v29, %v641_v55 }
 0x36c   :  { %v629_v58 = vmul.f32 %v1050_v46, %v628_v56  ;;  %v805_v56 = vperm.slane %v1400_v59, 2 }
 0x36d   :  { %v650_v60 = vmax.f32 %v646_v57, 0.0 }
 0x36e   :  { %v633_v61 = vsel %vm632_vm8, %v1050_v46, %v629_v58 }
 0x36f   :  { %v637_v63 = vmul.f32 %v633_v61, %v585_v28  ;;  %973 = vmatmul.msk.f32.gmra.mxu3 %vm380_vm14, %v650_v60  ;;  %977 = vmatmul.msk.f32.gmra.mxu1 %vm380_vm14, %v650_v60 }
 0x371   :  { %v642_v0 = vmul.f32 %v638_v22, %v637_v63 }
 0x373   :  { %v647_v1 = vadd.f32 %v643_v29, %v642_v0 }
 0x375   :  { %v651_v2 = vmax.f32 %v647_v1, 0.0 }
 0x377   :  { %974 = vmatmul.msk.f32.gmra.mxu3 %vm380_vm14, %v651_v2  ;;  %978 = vmatmul.msk.f32.gmra.mxu1 %vm380_vm14, %v651_v2 }
 0x3dc   :  { %v728_v6 = vpop.f32.mrf.mxu1 }
 0x3dd   :  { %v729_v16 = vadd.f32 %v728_v6, %v710_v9 }
 0x3e2   :  { %v690_v14 = vpop.f32.mrf.mxu3 }
 0x3e3   :  { %v691_v17 = vadd.f32 %v690_v14, %v660_v10 }
 0x3e4   :  { %v731_v32 = vpop.f32.mrf.mxu1 }
 0x3e5   :  { %v740_v18 = vsub.f32 %v691_v17, %v729_v16  ;;  %v732_v8 = vadd.f32 %v731_v32, %v710_v9 }
 0x3e7   :  { %v744_v20 = vmul.f32 0.5, %v740_v18 }
 0x3e9   :  { %v748_v22 = vmul.f32 %v744_v20, %v744_v20 }
 0x3ea   :  { %v693_v24 = vpop.f32.mrf.mxu3 }
 0x3eb   :  { %v752_v25 = vadd.f32 1e-05, %v748_v22  ;;  %v694_v26 = vadd.f32 %v693_v24, %v660_v10 }
 0x3ec   :  { %v734_v29 = vpop.f32.mrf.mxu1 }
 0x3ed   :  { %1051 = vrsqrt.f32 %v752_v25  ;;  %v741_v28 = vsub.f32 %v694_v26, %v732_v8  ;;  %v735_v35 = vadd.f32 %v734_v29, %v710_v9  ;;  %vm762_vm10 = vweird.f32 %v752_v25 }
 0x3ef   :  { %v745_v13 = vmul.f32 0.5, %v741_v28 }
 0x3f1   :  { %v749_v30 = vmul.f32 %v745_v13, %v745_v13 }
 0x3f2   :  { %v696_v31 = vpop.f32.mrf.mxu3 }
 0x3f3   :  { %v1052_v33 = vpop.eup %1051  ;;  %v753_v34 = vadd.f32 1e-05, %v749_v30  ;;  %v697_v36 = vadd.f32 %v696_v31, %v660_v10 }
 0x3f4   :  { %v757_v37 = vmul.f32 %v1052_v33, %v752_v25  ;;  %v737_v42 = vpop.f32.mrf.mxu1  ;;  %vm763_vm9 = vweird.f32 %v1052_v33 }
 0x3f5   :  { %1053 = vrsqrt.f32 %v753_v34  ;;  %v742_v38 = vsub.f32 %v697_v36, %v735_v35  ;;  %v738_v48 = vadd.f32 %v737_v42, %v710_v9  ;;  %vm764_vm11 = vmor %vm762_vm10, %vm763_vm9  ;;  %vm772_vm13 = vweird.f32 %v753_v34  ;;  %v1024_v36 = vld [vmem:[%s1459_s12] ss:$0 sm:$0xff] }
 0x3f6   :  { %v758_v39 = vmul.f32 %v1052_v33, %v757_v37 }
 0x3f7   :  { %v746_v40 = vmul.f32 0.5, %v742_v38 }
 0x3f8   :  { %v759_v41 = vmul.f32 0.5, %v758_v39 }
 0x3f9   :  { %v750_v43 = vmul.f32 %v746_v40, %v746_v40 }
 0x3fa   :  { %v760_v44 = vsub.f32 1.5, %v759_v41  ;;  %v699_v45 = vpop.f32.mrf.mxu3 }
 0x3fb   :  { %v1054_v46 = vpop.eup %1053  ;;  %v754_v47 = vadd.f32 1e-05, %v750_v43  ;;  %v700_v49 = vadd.f32 %v699_v45, %v660_v10 }
 0x3fc   :  { %v761_v50 = vmul.f32 %v1052_v33, %v760_v44  ;;  %v767_v51 = vmul.f32 %v1054_v46, %v753_v34  ;;  %vm773_vm12 = vweird.f32 %v1054_v46 }
 0x3fd   :  { %1055 = vrsqrt.f32 %v754_v47  ;;  %v743_v53 = vsub.f32 %v700_v49, %v738_v48  ;;  %vm774_vm15 = vmor %vm772_vm13, %vm773_vm12  ;;  %vm782_vm1 = vweird.f32 %v754_v47 }
 0x3fe   :  { %v765_v54 = vsel %vm764_vm11, %v1052_v33, %v761_v50  ;;  %v768_v55 = vmul.f32 %v1054_v46, %v767_v51 }
 0x3ff   :  { %v796_v57 = vmul.f32 %v765_v54, %v744_v20  ;;  %v747_v58 = vmul.f32 0.5, %v743_v53 }
 0x400   :  { %v769_v60 = vmul.f32 0.5, %v768_v55 }
 0x401   :  { %v801_v61 = vmul.f32 %v800_v52, %v796_v57  ;;  %v751_v63 = vmul.f32 %v747_v58, %v747_v58 }
 0x402   :  { %v770_v0 = vsub.f32 1.5, %v769_v60 }
 0x403   :  { %v1056_v1 = vpop.eup %1055  ;;  %v806_v2 = vadd.f32 %v805_v56, %v801_v61  ;;  %v755_v62 = vadd.f32 1e-05, %v751_v63 }
 0x404   :  { %v771_v5 = vmul.f32 %v1054_v46, %v770_v0  ;;  %v777_v6 = vmul.f32 %v1056_v1, %v754_v47  ;;  %vm783_vm0 = vweird.f32 %v1056_v1 }
 0x405   :  { %v810_v7 = vadd.f32 %v806_v2, %v1328_v4  ;;  %1057 = vrsqrt.f32 %v755_v62  ;;  %vm784_vm2 = vmor %vm782_vm1, %vm783_vm0  ;;  %vm792_vm4 = vweird.f32 %v755_v62 }
 0x406   :  { %v775_v9 = vsel %vm774_vm15, %v1054_v46, %v771_v5  ;;  %v778_v10 = vmul.f32 %v1056_v1, %v777_v6 }
 0x407   :  { %v814_v59 = vmax.f32 %v810_v7, 0.0  ;;  %v797_v11 = vmul.f32 %v775_v9, %v745_v13 }
 0x408   :  { %v779_v12 = vmul.f32 0.5, %v778_v10 }
 0x409   :  { %v802_v14 = vmul.f32 %v800_v52, %v797_v11  ;;  %979 = vmatmul.msk.f32.vlgmr.msra.gmra.mxu1 %vm380_vm14, %v814_v59 }
 0x40a   :  { %v780_v16 = vsub.f32 1.5, %v779_v12 }
 0x40b   :  { %v1058_v17 = vpop.eup %1057  ;;  %v807_v3 = vadd.f32 %v805_v56, %v802_v14 }
 0x40c   :  { %v781_v32 = vmul.f32 %v1056_v1, %v780_v16  ;;  %v787_v18 = vmul.f32 %v1058_v17, %v755_v62  ;;  %vm793_vm3 = vweird.f32 %v1058_v17 }
 0x40d   :  { %v811_v4 = vadd.f32 %v807_v3, %v1335_v15  ;;  %vm794_vm5 = vmor %vm792_vm4, %vm793_vm3 }
 0x40e   :  { %v785_v19 = vsel %vm784_vm2, %v1056_v1, %v781_v32  ;;  %v788_v20 = vmul.f32 %v1058_v17, %v787_v18 }
 0x40f   :  { %v798_v21 = vmul.f32 %v785_v19, %v746_v40  ;;  %v815_v22 = vmax.f32 %v811_v4, 0.0 }
 0x410   :  { %v789_v24 = vmul.f32 0.5, %v788_v20 }
 0x411   :  { %v803_v25 = vmul.f32 %v800_v52, %v798_v21  ;;  %980 = vmatmul.msk.f32.vlgmr.msrb.gmra.mxu2 %vm380_vm14, %v815_v22 }
 0x412   :  { %v790_v8 = vsub.f32 1.5, %v789_v24 }
 0x413   :  { %v808_v26 = vadd.f32 %v805_v56, %v803_v25 }
 0x414   :  { %v791_v28 = vmul.f32 %v1058_v17, %v790_v8 }
 0x415   :  { %v812_v29 = vadd.f32 %v808_v26, %v1342_v23 }
 0x416   :  { %v795_v13 = vsel %vm794_vm5, %v1058_v17, %v791_v28 }
 0x417   :  { %v799_v30 = vmul.f32 %v795_v13, %v747_v58  ;;  %v816_v31 = vmax.f32 %v812_v29, 0.0 }
 0x419   :  { %v804_v15 = vmul.f32 %v800_v52, %v799_v30  ;;  %981 = vmatmul.msk.f32.gmra.mxu2 %vm380_vm14, %v816_v31 }
 0x41b   :  { %v809_v33 = vadd.f32 %v805_v56, %v804_v15 }
 0x41d   :  { %v813_v34 = vadd.f32 %v809_v33, %v1349_v27 }
 0x41f   :  { %v817_v35 = vmax.f32 %v813_v34, 0.0 }
 0x421   :  { %982 = vmatmul.msk.f32.gmra.mxu2 %vm380_vm14, %v817_v35 }
 0x486   :  { %v859_v37 = vpop.f32.mrf.mxu1 }
 0x487   :  { %v860_v38 = vadd.f32 %v1024_v36, %v859_v37 }
 0x489   :  { %872 = vst.msk [vmem:[%s1460_s13] sm:$0xff] %vm871_vm6, %v860_v38 }
 0x494   :  { %v862_v23 = vpop.f32.mrf.mxu2 }
 0x495   :  { %v863_v39 = vadd.f32 %v1024_v36, %v862_v23 }
 0x497   :  { %873 = vst.msk [vmem:[%s1460_s13 + $0x8] sm:$0xff] %vm871_vm6, %v863_v39 }
 0x49c   :  { %v865_v27 = vpop.f32.mrf.mxu2 }
 0x49d   :  { %v866_v40 = vadd.f32 %v1024_v36, %v865_v27 }
 0x49f   :  { %874 = vst.msk [vmem:[%s1460_s13 + $0x10] sm:$0xff] %vm871_vm6, %v866_v40 }
 0x4a4   :  { %v868_v41 = vpop.f32.mrf.mxu2 }
 0x4a5   :  { %v869_v42 = vadd.f32 %v1024_v36, %v868_v41 }
 0x4a7   :  { %875 = vst.msk [vmem:[%s1460_s13 + $0x18] sm:$0xff] %vm871_vm6, %v869_v42 }
 0x4a8   :  { %880 = vsyncpa [#allocation3], 1 }

</bundles_post_ra>
